<compile_context>
chip_gen: v6e
topology: v6e:2x2x1
jax: 0.10.0
libtpu: 0.0.40
codegen_flags: <defaults>
</compile_context>

<pallas_src>
import functools

import jax
import jax.numpy as jnp
from jax import lax
from jax.experimental import pallas as pl
from jax.experimental.pallas import tpu as pltpu

BN_EPS = 1e-5
LANE = 128


def _round_up(a, b):
    return (a + b - 1) // b * b


def _vmem_limit_bytes():
    """Generation-aware scoped-VMEM limit (fallback 48 MiB: safe on v7x)."""
    try:
        cap = int(pltpu.get_tpu_info().vmem_capacity_bytes)
    except Exception:
        cap = 64 * 1024 * 1024
    return int(min(cap * 3 // 4, 96 * 1024 * 1024))


# ----------------------------- Pallas kernel -------------------------------

def _conv_mm_kernel(x_ref, w_ref, scale_ref, shift_ref, o_ref, *, relu6):
    """One (rows x G*Kp) @ (G*Kp x C_lane) tile of the packed 3x3 meta conv.

    x_ref     : (1, TRG, G*Kp)     group-packed im2col patches (compute dtype)
    w_ref     : (1, G*Kp, C_lane)  block-diagonal per-branch conv weight
    scale_ref : (1, 1, C_lane)     folded BN scale, tiled per group (f32)
    shift_ref : (1, 1, C_lane)     folded BN shift, tiled per group (f32)
    o_ref     : (1, TRG, C_lane)   dense 128-lane output tile (out dtype)
    """
    y = jnp.dot(x_ref[0], w_ref[0], preferred_element_type=jnp.float32)
    y = y * scale_ref[0] + shift_ref[0]      # f32 BN epilogue (scale not in w)
    if relu6:
        y = jnp.clip(y, 0.0, 6.0)            # ReLU6
    o_ref[0] = y.astype(o_ref.dtype)


# ------------------------------ wrappers -----------------------------------

def _im2col_3x3(x_nhwc, stride, k_pad_to):
    """(B,H,W,Cin) -> (B,Ho,Wo,k_pad_to) patches of a 3x3, pad=1, stride-s conv.

    The trailing k_pad_to - 9*Cin zero columns are emitted inside the concat so
    no separate pad pass over the patch tensor is needed.
    """
    b, h, w, cin = x_nhwc.shape
    ho = (h + 2 - 3) // stride + 1
    wo = (w + 2 - 3) // stride + 1
    xp = jnp.pad(x_nhwc, ((0, 0), (1, 1), (1, 1), (0, 0)))
    cols = []
    for kh in range(3):
        for kw in range(3):
            cols.append(lax.slice(
                xp,
                (0, kh, kw, 0),
                (b, kh + stride * (ho - 1) + 1, kw + stride * (wo - 1) + 1, cin),
                (1, stride, stride, 1)))
    k = 9 * cin
    if k_pad_to > k:
        cols.append(jnp.zeros((b, ho, wo, k_pad_to - k), x_nhwc.dtype))
    # channel index = (kh*3 + kw)*Cin + c  (must match the weight layout below)
    return jnp.concatenate(cols, axis=-1), ho, wo


def conv_3x3_bn_forward(params, x_stacked, *, stride, relu6=True,
                        tile_rows=8192, compute_dtype=jnp.bfloat16,
                        out_dtype=None):
    """Forward of torch `conv_3x3_bn` for all parallel branches.

    x_stacked: (P, N, Cin, H, W) -- the stacked list of per-branch NCHW inputs.
    Returns   (P, N, Cout, Ho, Wo) in `out_dtype` (default: compute_dtype).
    """
    if out_dtype is None:
        out_dtype = compute_dtype
    P, N, Cin, H, W = x_stacked.shape
    K = 9 * Cin
    Cout = params['fc_w'].shape[0] // K
    Kp = _round_up(K, 8)                              # sublane-aligned taps

    # Group-pack G output rows into the 128-lane dim when Cout divides 128.
    G = LANE // Cout if (0 < Cout < LANE and LANE % Cout == 0) else 1
    C_lane = _round_up(G * Cout, LANE)                # == 128 when packing

    # --- per-branch meta weights: fc(scale_i) reshaped to (Cout, Cin, 3, 3) --
    scales = 0.7 - 0.1 * jnp.arange(P, dtype=jnp.float32)               # (P,)
    w_flat = scales[:, None] * params['fc_w'][None, :] + params['fc_b'][None, :]
    w4 = w_flat.reshape(P, Cout, Cin, 3, 3)
    # (P, o, c, kh, kw) -> (P, kh, kw, c, o) -> (P, 9*Cin, Cout): matches im2col.
    w_mat = jnp.transpose(w4, (0, 3, 4, 2, 1)).reshape(P, K, Cout)
    w_kp = jnp.zeros((P, Kp, Cout), jnp.float32).at[:, :K, :].set(w_mat)

    # Block-diagonal weight: output lane h*Cout + c belongs to packed row h.
    eye = jnp.eye(G, dtype=jnp.float32)
    w_bd = jnp.einsum('gh,pkc->pgkhc', eye, w_kp).reshape(P, G * Kp, G * Cout)
    if G * Cout < C_lane:                             # only in the G=1 fallback
        w_bd = jnp.pad(w_bd, ((0, 0), (0, 0), (0, C_lane - G * Cout)))
    w_bd = w_bd.astype(compute_dtype)                 # bn_scale NOT folded in

    # --- eval-mode BatchNorm2dParallel as per-(branch, channel) scale/shift --
    bn_scale = params['bn_gamma'] * lax.rsqrt(params['bn_var'] + BN_EPS)
    bn_shift = params['bn_beta'] - params['bn_mean'] * bn_scale          # (P, Cout)
    scale_t = jnp.tile(bn_scale, (1, G))
    shift_t = jnp.tile(bn_shift, (1, G))
    if G * Cout < C_lane:
        pad = C_lane - G * Cout
        scale_t = jnp.pad(scale_t, ((0, 0), (0, pad)))
        shift_t = jnp.pad(shift_t, ((0, 0), (0, pad)))
    scale_t = scale_t.reshape(P, 1, C_lane).astype(jnp.float32)
    shift_t = shift_t.reshape(P, 1, C_lane).astype(jnp.float32)

    # --- im2col on compute-dtype data (pad + stride folded into the taps) ---
    x_nhwc = jnp.transpose(x_stacked, (0, 1, 3, 4, 2)).reshape(P * N, H, W, Cin)
    x_nhwc = x_nhwc.astype(compute_dtype)
    patches, Ho, Wo = _im2col_3x3(x_nhwc, stride, Kp)
    R = N * Ho * Wo
    patches = patches.reshape(P, R, Kp)

    # --- tile sizing in packed-row units (VMEM-capped), grid padding --------
    RG = pl.cdiv(R, G)
    in_b = jnp.dtype(compute_dtype).itemsize
    out_b = jnp.dtype(out_dtype).itemsize
    per_row = 2 * (G * Kp * in_b + C_lane * out_b)    # double-buffered in+out
    trg_cap = max(8, (24 * 1024 * 1024 // per_row) // 8 * 8)
    trg = min(_round_up(max(tile_rows // G, 8), 8), trg_cap, _round_up(RG, 8))
    RGp = _round_up(RG, trg)
    Rp = RGp * G
    if Rp > R:
        patches = jnp.pad(patches, ((0, 0), (0, Rp - R), (0, 0)))
    x_packed = patches.reshape(P, RGp, G * Kp)        # free contiguous reshape

    grid = (P, RGp // trg)
    out = pl.pallas_call(
        functools.partial(_conv_mm_kernel, relu6=relu6),
        out_shape=jax.ShapeDtypeStruct((P, RGp, C_lane), out_dtype),
        grid=grid,
        in_specs=[
            pl.BlockSpec((1, trg, G * Kp), lambda p, r: (p, r, 0)),
            pl.BlockSpec((1, G * Kp, C_lane), lambda p, r: (p, 0, 0)),
            pl.BlockSpec((1, 1, C_lane), lambda p, r: (p, 0, 0)),
            pl.BlockSpec((1, 1, C_lane), lambda p, r: (p, 0, 0)),
        ],
        out_specs=pl.BlockSpec((1, trg, C_lane), lambda p, r: (p, r, 0)),
        compiler_params=pltpu.CompilerParams(
            dimension_semantics=("parallel", "parallel"),
            vmem_limit_bytes=_vmem_limit_bytes()),
    )(x_packed, w_bd, scale_t, shift_t)

    # Unpack: (P, RGp, 128) -> (P, Rp, Cout) is a free contiguous reshape.
    if G > 1:
        out = out.reshape(P, Rp, Cout)
    else:
        out = out[:, :, :Cout]
    # NOTE: padded tail rows (>= R) hold clip(shift, 0, 6) garbage; the [:R]
    # slice must stay (it is a no-op when R is already tile-aligned).
    out = out[:, :R].reshape(P, N, Ho, Wo, Cout)
    return jnp.transpose(out, (0, 1, 4, 2, 3))        # back to per-branch NCHW


# ------------------------- params & pure-JAX reference ----------------------

def init_params(key, *, inp, oup, num_parallel):
    kw, kb = jax.random.split(key)
    fan = oup * inp * 9
    # nn.Linear(1, fan): weight (fan, 1) -> stored flat, bias (fan,)
    fc_w = jax.random.uniform(kw, (fan,), jnp.float32, -1.0, 1.0)
    fc_b = jax.random.uniform(kb, (fan,), jnp.float32, -1.0, 1.0)
    ones = jnp.ones((num_parallel, oup), jnp.float32)
    zeros = jnp.zeros((num_parallel, oup), jnp.float32)
    return dict(fc_w=fc_w, fc_b=fc_b,
                bn_gamma=ones, bn_beta=zeros, bn_mean=zeros, bn_var=ones)


def conv_3x3_bn_reference(params, x_stacked, *, stride, relu6=True):
    """Pure-JAX (XLA) reference matching the torch module (eval-mode BN)."""
    P, N, Cin, H, W = x_stacked.shape
    Cout = params['fc_w'].shape[0] // (9 * Cin)
    outs = []
    for i in range(P):
        w = ((0.7 - 0.1 * i) * params['fc_w'] + params['fc_b']
             ).reshape(Cout, Cin, 3, 3)
        y = lax.conv_general_dilated(
            x_stacked[i], w, window_strides=(stride, stride),
            padding=((1, 1), (1, 1)),
            dimension_numbers=('NCHW', 'OIHW', 'NCHW'))
        g = params['bn_gamma'][i][None, :, None, None]
        b = params['bn_beta'][i][None, :, None, None]
        m = params['bn_mean'][i][None, :, None, None]
        v = params['bn_var'][i][None, :, None, None]
        y = (y - m) * lax.rsqrt(v + BN_EPS) * g + b
        if relu6:
            y = jnp.clip(y, 0.0, 6.0)
        outs.append(y)
    return jnp.stack(outs, axis=0)


if __name__ == "__main__":
    num_parallel, n, cin, cout = 2, 2, 3, 16
    h = w = 16
    stride = 2

    key = jax.random.PRNGKey(0)
    pkey, xkey = jax.random.split(key)
    params = init_params(pkey, inp=cin, oup=cout, num_parallel=num_parallel)
    x = jax.random.normal(xkey, (num_parallel, n, cin, h, w), jnp.float32)

    ref = conv_3x3_bn_reference(params, x, stride=stride)

    # f32 compute path: tight check against the XLA reference.
    fwd_f32 = jax.jit(functools.partial(conv_3x3_bn_forward, stride=stride,
                                        compute_dtype=jnp.float32))
    out_f32 = fwd_f32(params, x)
    jax.block_until_ready(out_f32)
    assert out_f32.shape == (num_parallel, n, cout, h // 2, w // 2), out_f32.shape
    err_f32 = float(jnp.max(jnp.abs(out_f32.astype(jnp.float32) - ref)))
    assert err_f32 < 1e-3, err_f32

    # bf16 compute + bf16 output (default; bandwidth win), f32 MXU accumulation
    # and f32 BN/ReLU6 epilogue in-kernel.
    fwd_bf16 = jax.jit(functools.partial(conv_3x3_bn_forward, stride=stride))
    out_bf16 = fwd_bf16(params, x)
    jax.block_until_ready(out_bf16)
    assert out_bf16.dtype == jnp.bfloat16
    assert bool(jnp.all(jnp.isfinite(out_bf16.astype(jnp.float32))))
    err_bf16 = float(jnp.max(jnp.abs(out_bf16.astype(jnp.float32) - ref)))
    assert err_bf16 < 0.35, err_bf16

    print("KERNEL_OK")
</pallas_src>

<mosaic_0001>
module attributes {stable_mosaic.version = 11 : i64} {
  func.func @_conv_mm_kernel(%arg0: i32, %arg1: i32, %arg2: memref<1x16x256xf32, #tpu.memory_space<vmem>>, %arg3: memref<1x256x128xf32, #tpu.memory_space<vmem>>, %arg4: memref<1x1x128xf32, #tpu.memory_space<vmem>>, %arg5: memref<1x1x128xf32, #tpu.memory_space<vmem>>, %arg6: memref<1x16x128xf32, #tpu.memory_space<vmem>>) attributes {dimension_semantics = [#tpu.dimension_semantics<parallel>, #tpu.dimension_semantics<parallel>], iteration_bounds = array<i64: 2, 1>, scalar_prefetch = 0 : i64, scratch_operands = 0 : i64, tpu.core_type = #tpu.core_type<tc>, window_params = [{transform_indices = @transform_0, window_bounds = array<i64: 1, 16, 256>}, {transform_indices = @transform_1, window_bounds = array<i64: 1, 256, 128>}, {transform_indices = @transform_2, window_bounds = array<i64: 1, 1, 128>}, {transform_indices = @transform_3, window_bounds = array<i64: 1, 1, 128>}, {transform_indices = @transform_4, window_bounds = array<i64: 1, 16, 128>}]} {
    %c0 = arith.constant 0 : index
    %c0_0 = arith.constant 0 : index
    %c0_1 = arith.constant 0 : index
    %0 = vector.load %arg2[%c0, %c0_0, %c0_1] : memref<1x16x256xf32, #tpu.memory_space<vmem>>, vector<1x16x256xf32>
    %1 = vector.shape_cast %0 : vector<1x16x256xf32> to vector<16x256xf32>
    %c0_2 = arith.constant 0 : index
    %c0_3 = arith.constant 0 : index
    %c0_4 = arith.constant 0 : index
    %2 = vector.load %arg3[%c0_2, %c0_3, %c0_4] : memref<1x256x128xf32, #tpu.memory_space<vmem>>, vector<1x256x128xf32>
    %3 = vector.shape_cast %2 : vector<1x256x128xf32> to vector<256x128xf32>
    %cst = arith.constant dense<0.000000e+00> : vector<16x128xf32>
    %4 = tpu.matmul %1, %3, %cst {dimension_numbers = #tpu.dot_dimension_numbers<[1], [0], [0], [1], [0, 0, 1, 1], [], []>} : vector<16x256xf32>, vector<256x128xf32>, vector<16x128xf32> -> vector<16x128xf32>
    %c0_5 = arith.constant 0 : index
    %c0_6 = arith.constant 0 : index
    %c0_7 = arith.constant 0 : index
    %5 = vector.load %arg4[%c0_5, %c0_6, %c0_7] : memref<1x1x128xf32, #tpu.memory_space<vmem>>, vector<1x1x128xf32>
    %6 = vector.shape_cast %5 : vector<1x1x128xf32> to vector<1x128xf32>
    %7 = vector.broadcast %6 : vector<1x128xf32> to vector<16x128xf32>
    %8 = arith.mulf %4, %7 : vector<16x128xf32>
    %c0_8 = arith.constant 0 : index
    %c0_9 = arith.constant 0 : index
    %c0_10 = arith.constant 0 : index
    %9 = vector.load %arg5[%c0_8, %c0_9, %c0_10] : memref<1x1x128xf32, #tpu.memory_space<vmem>>, vector<1x1x128xf32>
    %10 = vector.shape_cast %9 : vector<1x1x128xf32> to vector<1x128xf32>
    %11 = vector.broadcast %10 : vector<1x128xf32> to vector<16x128xf32>
    %12 = arith.addf %8, %11 : vector<16x128xf32>
    %cst_11 = arith.constant 0.000000e+00 : f32
    %cst_12 = arith.constant 6.000000e+00 : f32
    %13 = vector.broadcast %cst_11 : f32 to vector<16x128xf32>
    %14 = arith.maximumf %13, %12 : vector<16x128xf32>
    %15 = vector.broadcast %cst_12 : f32 to vector<16x128xf32>
    %16 = arith.minimumf %15, %14 : vector<16x128xf32>
    %c0_13 = arith.constant 0 : index
    %c0_14 = arith.constant 0 : index
    %c0_15 = arith.constant 0 : index
    %17 = vector.load %arg6[%c0_13, %c0_14, %c0_15] : memref<1x16x128xf32, #tpu.memory_space<vmem>>, vector<1x16x128xf32>
    %18 = vector.shape_cast %17 : vector<1x16x128xf32> to vector<16x128xf32>
    %19 = vector.shape_cast %16 : vector<16x128xf32> to vector<1x16x128xf32>
    tpu.vector_store %arg6[%c0_13, %c0_14, %c0_15], %19 {strides = array<i32>} : memref<1x16x128xf32, #tpu.memory_space<vmem>>, vector<1x16x128xf32>,
    return
  }
  func.func @transform_0(%arg0: i32, %arg1: i32) -> (i32, i32, i32) {
    %c0_i32 = arith.constant 0 : i32
    %c0_i32_0 = arith.constant 0 : i32
    return %arg0, %arg1, %c0_i32 : i32, i32, i32
  }
  func.func @transform_1(%arg0: i32, %arg1: i32) -> (i32, i32, i32) {
    %c0_i32 = arith.constant 0 : i32
    %c0_i32_0 = arith.constant 0 : i32
    %c0_i32_1 = arith.constant 0 : i32
    return %arg0, %c0_i32, %c0_i32_0 : i32, i32, i32
  }
  func.func @transform_2(%arg0: i32, %arg1: i32) -> (i32, i32, i32) {
    %c0_i32 = arith.constant 0 : i32
    %c0_i32_0 = arith.constant 0 : i32
    %c0_i32_1 = arith.constant 0 : i32
    return %arg0, %c0_i32, %c0_i32_0 : i32, i32, i32
  }
  func.func @transform_3(%arg0: i32, %arg1: i32) -> (i32, i32, i32) {
    %c0_i32 = arith.constant 0 : i32
    %c0_i32_0 = arith.constant 0 : i32
    %c0_i32_1 = arith.constant 0 : i32
    return %arg0, %c0_i32, %c0_i32_0 : i32, i32, i32
  }
  func.func @transform_4(%arg0: i32, %arg1: i32) -> (i32, i32, i32) {
    %c0_i32 = arith.constant 0 : i32
    %c0_i32_0 = arith.constant 0 : i32
    return %arg0, %arg1, %c0_i32 : i32, i32, i32
  }
}

</mosaic_0001>

<bundles_post_ra>
// kernel: conv_3x3_bn_forward.1
= control target key start
LH: loop header
LB: loop body
LE: loop exit
PB: predicated region body
PF: predicated region fallthrough
CT: control target
= control target key end

     0   :  { %s704_s15 = smov 0   ;;  %s706_s16 = smov 0   ;;  %s787_s0 = inlined_call_operand.vmem [shape: f32[2,16,256], index: 0, kind: input, shape index: {}]   ;;  %s788_s1 = inlined_call_operand.vmem [shape: f32[2,256,128], index: 1, kind: input, shape index: {}]   ;;  %s789_s2 = inlined_call_operand.vmem [shape: f32[2,1,128], index: 2, kind: input, shape index: {}]   ;;  %s790_s3 = inlined_call_operand.vmem [shape: f32[2,1,128], index: 3, kind: input, shape index: {}]   ;;  %s791_s4 = inlined_call_operand.vmem [shape: f32[2,16,128], index: 4, kind: output, shape index: {}]  }
   0x1   :  { %s708_s17 = smov 0  }
   0x2 LB: > { %s26_s18 = sadd.s32 1, %s673_s16  ;;  %p547_p0 = scmp.ge.s32.totalorder %s677_s17, 1  ;;  %s677_s17 = sphi %s708_s17, %s14_s17   ;;  %s673_s16 = sphi %s706_s16, %s793_s16   ;;  %s669_s15 = sphi %s704_s15, %s792_s15  }
   0x3   : > { %p28_p1 = scmp.ge.s32.totalorder %s26_s18, 2  ;;  %p210_p2 = scmp.lt.s32.totalorder %s677_s17, 3 }
   0x5   : > { %s795_s18 = smov (%p28_p1, %s26_s18), 0  ;;  %p211_p3 = pnand %p547_p0, %p210_p2 }
   0x6   : > { %p257_p4 = scmp.lt.s32.totalorder (!%p211_p3), %s669_s15, 1 }
   0x7   : > { %214 = sbr.rel (%p211_p3) target bundleno = 255 (0xff), region = 36 }
   0xc   : > { %s797_s15 = smov (!%p257_p4, %s669_s15), 1 }
   0xd   : > { %s559_s19 = sshll.u32 %s797_s15, 8  ;;  %s558_s23 = sshll.u32 %s797_s15, 5 }
   0xe   : > { %s728_s22 = scalar_lea.vmem %s788_s1, %s559_s19  ;;  %s265_s26 = scalar_lea.vmem %s787_s0, %s558_s23 }
   0xf   : > { %v323_v0 = vld [vmem:[%s728_s22 + $0xf8] sm:$0xff]  ;;  %v322_v2 = vld [vmem:[%s728_s22 + $0xf0] sm:$0xff]  ;;  %v321_v4 = vld [vmem:[%s728_s22 + $0xe8] sm:$0xff]  ;;  %s274_s29 = scalar_lea.vmem %s789_s2, %s797_s15  ;;  %s277_s6 = scalar_lea.vmem %s790_s3, %s797_s15 }
  0x10   : > { %v307_v1 = vld [vmem:[%s728_s22 + $0x78] sm:$0xff]  ;;  %561 = vmatprep.subr.mxu0 %v323_v0  ;;  %599 = vmatprep.subr.mxu1 %v323_v0  ;;  %v306_v3 = vld [vmem:[%s728_s22 + $0x70] sm:$0xff]  ;;  %v305_v5 = vld [vmem:[%s728_s22 + $0x68] sm:$0xff]  ;;  %s560_s7 = sshll.u32 %s797_s15, 4 }
  0x11   : > { %562 = vmatpush3.msra.mxu0 %v307_v1  ;;  %615 = vmatpush3.msra.mxu1 %v307_v1  ;;  %v320_v6 = vld [vmem:[%s728_s22 + $0xe0] sm:$0xff]  ;;  %v319_v8 = vld [vmem:[%s728_s22 + $0xd8] sm:$0xff]  ;;  %v318_v10 = vld [vmem:[%s728_s22 + $0xd0] sm:$0xff]  ;;  %s286_s10 = scalar_lea.vmem %s791_s4, %s560_s7 }
  0x12   : > { %563 = vmatprep.subr.mxu0 %v322_v2  ;;  %600 = vmatprep.subr.mxu1 %v322_v2  ;;  %v304_v7 = vld [vmem:[%s728_s22 + $0x60] sm:$0xff]  ;;  %v303_v9 = vld [vmem:[%s728_s22 + $0x58] sm:$0xff]  ;;  %v302_v11 = vld [vmem:[%s728_s22 + $0x50] sm:$0xff] }
  0x13   : > { %564 = vmatpush3.msra.mxu0 %v306_v3  ;;  %616 = vmatpush3.msra.mxu1 %v306_v3  ;;  %v317_v12 = vld [vmem:[%s728_s22 + $0xc8] sm:$0xff]  ;;  %v316_v14 = vld [vmem:[%s728_s22 + $0xc0] sm:$0xff]  ;;  %v315_v16 = vld [vmem:[%s728_s22 + $0xb8] sm:$0xff] }
  0x14   : > { %565 = vmatprep.subr.mxu0 %v321_v4  ;;  %601 = vmatprep.subr.mxu1 %v321_v4  ;;  %v301_v13 = vld [vmem:[%s728_s22 + $0x48] sm:$0xff]  ;;  %v300_v15 = vld [vmem:[%s728_s22 + $0x40] sm:$0xff]  ;;  %v299_v17 = vld [vmem:[%s728_s22 + $0x38] sm:$0xff] }
  0x15   : > { %566 = vmatpush3.msra.mxu0 %v305_v5  ;;  %617 = vmatpush3.msra.mxu1 %v305_v5  ;;  %v314_v18 = vld [vmem:[%s728_s22 + $0xb0] sm:$0xff]  ;;  %v313_v20 = vld [vmem:[%s728_s22 + $0xa8] sm:$0xff]  ;;  %v312_v22 = vld [vmem:[%s728_s22 + $0xa0] sm:$0xff] }
  0x16   : > { %567 = vmatprep.subr.mxu0 %v320_v6  ;;  %602 = vmatprep.subr.mxu1 %v320_v6  ;;  %v298_v19 = vld [vmem:[%s728_s22 + $0x30] sm:$0xff]  ;;  %v297_v21 = vld [vmem:[%s728_s22 + $0x28] sm:$0xff]  ;;  %v296_v23 = vld [vmem:[%s728_s22 + $0x20] sm:$0xff] }
  0x17   : > { %568 = vmatpush3.msra.mxu0 %v304_v7  ;;  %618 = vmatpush3.msra.mxu1 %v304_v7  ;;  %v311_v24 = vld [vmem:[%s728_s22 + $0x98] sm:$0xff]  ;;  %v310_v26 = vld [vmem:[%s728_s22 + $0x90] sm:$0xff]  ;;  %v309_v28 = vld [vmem:[%s728_s22 + $0x88] sm:$0xff] }
  0x18   : > { %569 = vmatprep.subr.mxu0 %v319_v8  ;;  %603 = vmatprep.subr.mxu1 %v319_v8  ;;  %v295_v25 = vld [vmem:[%s728_s22 + $0x18] sm:$0xff]  ;;  %v294_v27 = vld [vmem:[%s728_s22 + $0x10] sm:$0xff]  ;;  %v293_v29 = vld [vmem:[%s728_s22 + $0x8] sm:$0xff] }
  0x19   : > { %570 = vmatpush3.msra.mxu0 %v303_v9  ;;  %619 = vmatpush3.msra.mxu1 %v303_v9  ;;  %v308_v30 = vld [vmem:[%s728_s22 + $0x80] sm:$0xff]  ;;  %v289_v32 = vld [vmem:[%s265_s26 + $0x8] sm:$0xff]  ;;  %v291_v33 = vld [vmem:[%s265_s26 + $0x18] sm:$0xff] }
  0x1a   : > { %571 = vmatprep.subr.mxu0 %v318_v10  ;;  %604 = vmatprep.subr.mxu1 %v318_v10  ;;  %v292_v31 = vld [vmem:[%s728_s22] sm:$0xff]  ;;  %v290_v35 = vld [vmem:[%s265_s26 + $0x10] sm:$0xff] }
  0x1b   : > { %572 = vmatpush3.msra.mxu0 %v302_v11  ;;  %620 = vmatpush3.msra.mxu1 %v302_v11  ;;  %v288_v34 = vld [vmem:[%s265_s26] sm:$0xff] }
  0x1c   : > { %573 = vmatprep.subr.mxu0 %v317_v12  ;;  %605 = vmatprep.subr.mxu1 %v317_v12  ;;  %v554_v39 = vld [vmem:[%s274_s29] ss:$0 sm:$0xff] }
  0x1d   : > { %574 = vmatpush3.msra.mxu0 %v301_v13  ;;  %621 = vmatpush3.msra.mxu1 %v301_v13  ;;  %v555_v43 = vld [vmem:[%s277_s6] ss:$0 sm:$0xff] }
  0x1e   : > { %575 = vmatprep.subr.mxu0 %v316_v14  ;;  %606 = vmatprep.subr.mxu1 %v316_v14 }
  0x1f   : > { %576 = vmatpush3.msra.mxu0 %v300_v15  ;;  %622 = vmatpush3.msra.mxu1 %v300_v15 }
  0x20   : > { %577 = vmatprep.subr.mxu0 %v315_v16  ;;  %607 = vmatprep.subr.mxu1 %v315_v16 }
  0x21   : > { %578 = vmatpush3.msra.mxu0 %v299_v17  ;;  %623 = vmatpush3.msra.mxu1 %v299_v17 }
  0x22   : > { %579 = vmatprep.subr.mxu0 %v314_v18  ;;  %608 = vmatprep.subr.mxu1 %v314_v18 }
  0x23   : > { %580 = vmatpush3.msra.mxu0 %v298_v19  ;;  %624 = vmatpush3.msra.mxu1 %v298_v19 }
  0x24   : > { %581 = vmatprep.subr.mxu0 %v313_v20  ;;  %609 = vmatprep.subr.mxu1 %v313_v20 }
  0x25   : > { %582 = vmatpush3.msra.mxu0 %v297_v21  ;;  %625 = vmatpush3.msra.mxu1 %v297_v21 }
  0x26   : > { %583 = vmatprep.subr.mxu0 %v312_v22  ;;  %610 = vmatprep.subr.mxu1 %v312_v22 }
  0x27   : > { %584 = vmatpush3.msra.mxu0 %v296_v23  ;;  %626 = vmatpush3.msra.mxu1 %v296_v23 }
  0x28   : > { %585 = vmatprep.subr.mxu0 %v311_v24  ;;  %611 = vmatprep.subr.mxu1 %v311_v24 }
  0x29   : > { %586 = vmatpush3.msra.mxu0 %v295_v25  ;;  %627 = vmatpush3.msra.mxu1 %v295_v25 }
  0x2a   : > { %587 = vmatprep.subr.mxu0 %v310_v26  ;;  %612 = vmatprep.subr.mxu1 %v310_v26 }
  0x2b   : > { %588 = vmatpush3.msra.mxu0 %v294_v27  ;;  %628 = vmatpush3.msra.mxu1 %v294_v27 }
  0x2c   : > { %589 = vmatprep.subr.mxu0 %v309_v28  ;;  %613 = vmatprep.subr.mxu1 %v309_v28 }
  0x2d   : > { %590 = vmatpush3.msra.mxu0 %v293_v29  ;;  %629 = vmatpush3.msra.mxu1 %v293_v29 }
  0x2e   : > { %591 = vmatprep.subr.mxu0 %v308_v30  ;;  %614 = vmatprep.subr.mxu1 %v308_v30 }
  0x2f   : > { %592 = vmatpush3.msra.mxu0 %v292_v31  ;;  %630 = vmatpush3.msra.mxu1 %v292_v31 }
  0x30   : > { %388 = vmatprep.mubr.f32.mxu0 %v289_v32  ;;  %393 = vmatprep.mubr.f32.mxu1 %v291_v33 }
  0x31   : > { %389 = vmatmul.mubr.f32.vlgmr.msra.gmra.mxu0 %v288_v34  ;;  %394 = vmatmul.mubr.f32.vlgmr.msra.gmra.mxu1 %v290_v35 }
  0xf1   : > { %v593_v36 = vpop.f32.mrf.mxu0  ;;  %v596_v37 = vpop.f32.mrf.mxu1 }
  0xf3   : > { %v594_v38 = vpop.f32.mrf.mxu0  ;;  %v597_v40 = vpop.f32.mrf.mxu1 }
  0xf4   : > { %v595_v41 = vadd.f32 %v594_v38, %v593_v36  ;;  %v598_v42 = vadd.f32 %v597_v40, %v596_v37 }
  0xf6   : > { %v406_v44 = vmul.f32 %v595_v41, %v554_v39  ;;  %v407_v45 = vmul.f32 %v598_v42, %v554_v39 }
  0xf8   : > { %v415_v46 = vadd.f32 %v555_v43, %v406_v44  ;;  %v416_v47 = vadd.f32 %v555_v43, %v407_v45 }
  0xfa   : > { %v417_v48 = vmax.f32 %v415_v46, 0.0  ;;  %v418_v49 = vmax.f32 %v416_v47, 0.0 }
  0xfc   : > { %v419_v50 = vmin.f32 %v417_v48, 6.0  ;;  %v420_v51 = vmin.f32 %v418_v49, 6.0 }
  0xfe   : > { %421 = vst [vmem:[%s286_s10] sm:$0xff] %v419_v50  ;;  %422 = vst [vmem:[%s286_s10 + $0x8] sm:$0xff] %v420_v51 }
  0xff PF: > { %s14_s17 = sadd.s32 1, %s677_s17   ;;  %s792_s15 = smov %s673_s16 }
 0x100   : > { %p11_p5 = scmp.ge.s32.totalorder %s14_s17, 4   ;;  %s793_s16 = smov %s795_s18 }
 0x102   :  { %13 = sbr.rel (!%p11_p5) target bundleno = 2 (0x2), region = 75 }

</bundles_post_ra>
